<compile_context>
chip_gen: v7x
topology: tpu7x:2x2x1
jax: 0.10.0
libtpu: 0.0.40
codegen_flags: <defaults>
</compile_context>

<pallas_src>
import functools
import math

import jax
import jax.numpy as jnp
from jax import lax
from jax.experimental import pallas as pl
from jax.experimental.pallas import tpu as pltpu


VMEM_LIMIT_BYTES = 48 * 1024 * 1024   # > v5e 16 MiB default scope, < v7x 64 MiB physical


# --------------------------------------------------------------------------
# Pallas kernel
# --------------------------------------------------------------------------
def _global_pointer_kernel(h_ref, w_ref, b_ref, cs_ref, amc_ref, negb_ref,
                           out_ref, q_scr, k_scr, *, seq_len, inner_dim, q_tile):
    S, D, TQ = seq_len, inner_dim, q_tile
    half = D // 2
    qi = pl.program_id(2)
    scale = 1.0 / math.sqrt(D)
    neg_big = jnp.float32(-1e12 * scale)

    # ---- once per (batch, entity): fused q|k projection + RoPE into scratch ----
    @pl.when(qi == 0)
    def _project_and_rope():
        h = h_ref[...]                                   # (S, H)   bf16
        w = w_ref[...]                                   # (H, 2D)  bf16, cols [qa|qb|ka|kb]
        qk = jnp.dot(h, w, preferred_element_type=jnp.float32) + b_ref[...]   # (S, 2D) f32

        cs = cs_ref[...]                                 # (S, D) = [cos | sin]
        c = cs[:, :half]
        s = cs[:, half:]
        amc = amc_ref[...]                               # (S, 1) f32 in {0,1}: key-row mask

        qa = qk[:, 0 * half:1 * half]
        qb = qk[:, 1 * half:2 * half]
        ka = qk[:, 2 * half:3 * half]
        kb = qk[:, 3 * half:4 * half]
        # Rotate-half RoPE in the de-interleaved basis (pure VPU).  Fold the
        # 1/sqrt(D) scale into q (f32, before bf16 cast) and the pad mask into
        # k rows (exact: mask is {0,1}); the inner loop then needs neither.
        q_scr[:, :half] = ((qa * c - qb * s) * scale).astype(q_scr.dtype)
        q_scr[:, half:] = ((qb * c + qa * s) * scale).astype(q_scr.dtype)
        k_scr[:, :half] = ((ka * c - kb * s) * amc).astype(k_scr.dtype)
        k_scr[:, half:] = ((kb * c + ka * s) * amc).astype(k_scr.dtype)

    # ---- per query tile: bilinear scores + cheap mask epilogue ----
    row0 = pl.multiple_of(qi * TQ, TQ)
    q_t = q_scr[pl.ds(row0, TQ), :]                      # (TQ, D) bf16 (scale folded)
    lg = lax.dot_general(q_t, k_scr[...], (((1,), (1,)), ((), ())),
                         preferred_element_type=jnp.float32)          # (TQ, S) f32
    # lg already equals logits * pad * scale; add the additive pad/tril biases.
    row = lax.broadcasted_iota(jnp.int32, (TQ, S), 0) + row0
    col = lax.broadcasted_iota(jnp.int32, (TQ, S), 1)
    tril_add = jnp.where(row > col, neg_big, jnp.float32(0.0))        # strictly-lower tri
    out_ref[...] = (lg + tril_add + negb_ref[...]).astype(out_ref.dtype)


# --------------------------------------------------------------------------
# Wrapper: trace-time parameter plumbing + pallas_call
# --------------------------------------------------------------------------
def _pick_q_tile(S, H, D, out_bytes, vmem_budget_bytes):
    """Largest lane-friendly query tile whose double-buffered VMEM use fits."""
    fixed = (2 * S * H * 2            # hidden block (bf16, double-buffered)
             + 2 * H * 2 * D * 2      # W_qk per entity (bf16)
             + 2 * 1 * 2 * D * 4      # bias
             + 2 * S * D * 4          # cos|sin table (f32)
             + 2 * S * 4 + 2 * S * 4  # key-row mask + column bias rows
             + 2 * S * D * 2)         # q/k rotated scratch (bf16)
    for t in (512, 256, 128, 64, 32, 16, 8):
        if S % t == 0 and fixed + 2 * t * S * out_bytes <= vmem_budget_bytes:
            return t
    return 8 if S % 8 == 0 else S


def global_pointer_forward(last_hidden_state, attention_mask, dense_w, dense_b,
                           *, ent_type_size, inner_dim, rope=True, q_tile=None,
                           out_dtype=jnp.float32):
    """last_hidden_state: (B, S, H) f32, attention_mask: (B, S) in {0,1}."""
    B, S, H = last_hidden_state.shape
    E, D = ent_type_size, inner_dim
    assert D % 2 == 0
    half = D // 2
    assert dense_w.shape == (H, E * 2 * D) and dense_b.shape == (E * 2 * D,)

    out_bytes = jnp.dtype(out_dtype).itemsize
    TQ = q_tile if q_tile is not None else _pick_q_tile(
        S, H, D, out_bytes, int(0.75 * VMEM_LIMIT_BYTES))
    assert S % TQ == 0
    nq = S // TQ
    scale = 1.0 / math.sqrt(D)

    # Split the dense weight per entity into q / k column blocks and de-interleave
    # each block into rotate-half layout [even | odd].  q.k^T is invariant to a
    # permutation applied to both, so the logits are unchanged.
    w3 = dense_w.reshape(H, E, 2 * D)
    wq, wk = w3[:, :, :D], w3[:, :, D:]
    w_perm = jnp.concatenate(
        [wq[:, :, 0::2], wq[:, :, 1::2], wk[:, :, 0::2], wk[:, :, 1::2]], axis=-1)
    w_e = jnp.transpose(w_perm, (1, 0, 2)).astype(jnp.bfloat16)        # (E, H, 2D)

    b3 = dense_b.reshape(E, 2 * D)
    bq, bk = b3[:, :D], b3[:, D:]
    b_e = jnp.concatenate(
        [bq[:, 0::2], bq[:, 1::2], bk[:, 0::2], bk[:, 1::2]], axis=-1)
    b_e = b_e[:, None, :].astype(jnp.float32)                          # (E, 1, 2D)

    # sinusoidal tables packed into one lane-dense (S, D) = [cos | sin] table
    pos = jnp.arange(S, dtype=jnp.float32)[:, None]
    inv = jnp.power(10000.0, -2.0 * jnp.arange(half, dtype=jnp.float32) / D)
    ang = pos * inv                                                    # (S, D/2)
    if rope:
        cos_t, sin_t = jnp.cos(ang), jnp.sin(ang)
    else:
        cos_t, sin_t = jnp.ones_like(ang), jnp.zeros_like(ang)
    cs = jnp.concatenate([cos_t, sin_t], axis=1)                       # (S, D)

    h_bf = last_hidden_state.astype(jnp.bfloat16)
    am = attention_mask.astype(jnp.float32)
    am_col = am[:, :, None]                                            # (B, S, 1)
    negb = ((am - 1.0) * (1e12 * scale))[:, None, :]                   # (B, 1, S)

    kernel = functools.partial(_global_pointer_kernel,
                               seq_len=S, inner_dim=D, q_tile=TQ)

    # TODO(synk): on v7x the constant-index h/cos|sin inputs could use
    # pipeline_mode=pl.Buffered(1) to drop their dead second VMEM buffer.
    return pl.pallas_call(
        kernel,
        out_shape=jax.ShapeDtypeStruct((B, E, S, S), out_dtype),
        grid_spec=pltpu.PrefetchScalarGridSpec(
            num_scalar_prefetch=0,
            grid=(B, E, nq),
            in_specs=[
                pl.BlockSpec((None, S, H), lambda b, e, q: (b, 0, 0)),      # hidden (bf16)
                pl.BlockSpec((None, H, 2 * D), lambda b, e, q: (e, 0, 0)),  # W_qk per entity
                pl.BlockSpec((None, 1, 2 * D), lambda b, e, q: (e, 0, 0)),  # bias per entity
                pl.BlockSpec((S, D), lambda b, e, q: (0, 0)),               # cos|sin table
                pl.BlockSpec((None, S, 1), lambda b, e, q: (b, 0, 0)),      # key-row pad mask
                pl.BlockSpec((None, 1, S), lambda b, e, q: (b, 0, 0)),      # column pad bias
            ],
            out_specs=pl.BlockSpec((None, None, TQ, S), lambda b, e, q: (b, e, q, 0)),
            scratch_shapes=[pltpu.VMEM((S, D), jnp.bfloat16),               # rotated q*scale
                            pltpu.VMEM((S, D), jnp.bfloat16)],              # rotated k*mask
        ),
        compiler_params=pltpu.CompilerParams(
            dimension_semantics=("parallel", "parallel", "arbitrary"),
            vmem_limit_bytes=VMEM_LIMIT_BYTES),
    )(h_bf, w_e, b_e, cs, am_col, negb)


# --------------------------------------------------------------------------
# Pure-JAX reference (mirrors the PyTorch code path, f32 HIGHEST precision)
# --------------------------------------------------------------------------
def _reference(last_hidden_state, attention_mask, dense_w, dense_b, E, D):
    B, S, H = last_hidden_state.shape
    out = last_hidden_state @ dense_w + dense_b                         # (B,S,E*2D)
    out = out.reshape(B, S, E, 2 * D)
    qw, kw = out[..., :D], out[..., D:]

    pos = jnp.arange(S, dtype=jnp.float32)[:, None]
    inv = jnp.power(10000.0, -2.0 * jnp.arange(D // 2, dtype=jnp.float32) / D)
    ang = pos * inv
    cos = jnp.repeat(jnp.cos(ang), 2, axis=-1)[None, :, None, :]        # (1,S,1,D)
    sin = jnp.repeat(jnp.sin(ang), 2, axis=-1)[None, :, None, :]

    def rope(x):
        x2 = jnp.stack([-x[..., 1::2], x[..., ::2]], axis=-1).reshape(x.shape)
        return x * cos + x2 * sin

    qw, kw = rope(qw), rope(kw)
    logits = jnp.einsum('bmhd,bnhd->bhmn', qw, kw,
                        precision=jax.lax.Precision.HIGHEST)
    pad = attention_mask.astype(jnp.float32)[:, None, None, :]
    logits = logits * pad - (1.0 - pad) * 1e12
    tril = jnp.tril(jnp.ones((S, S), jnp.float32), -1)
    logits = logits - tril * 1e12
    return logits / math.sqrt(D)


# --------------------------------------------------------------------------
if __name__ == "__main__":
    B, S, H = 2, 16, 32         # batch, seq_len, hidden_size
    E, D = 4, 64                # ent_type_size, inner_dim (2D = 128 -> lane dense)
    VOCAB = 100

    key = jax.random.PRNGKey(0)
    k_emb, k_type, k_w, k_b, k_ids = jax.random.split(key, 5)

    # TODO(synk): the external transformer `encoder` has no clean single-kernel
    # Pallas equivalent; it is replaced here by a deterministic embedding-sum
    # stand-in producing `last_hidden_state`.
    input_ids = jax.random.randint(k_ids, (B, S), 0, VOCAB)
    token_type_ids = jnp.zeros((B, S), jnp.int32)
    tok_emb = jax.random.normal(k_emb, (VOCAB, H), jnp.float32) * 0.1
    typ_emb = jax.random.normal(k_type, (2, H), jnp.float32) * 0.1
    last_hidden_state = tok_emb[input_ids] + typ_emb[token_type_ids]    # (B, S, H)

    lengths = jnp.array([12, 7], jnp.int32)
    attention_mask = (jnp.arange(S)[None, :] < lengths[:, None]).astype(jnp.float32)

    # nn.Linear(H, E*2D) parameters (stored as (H, out)), deterministic init
    dense_w = jax.random.normal(k_w, (H, E * 2 * D), jnp.float32) * (1.0 / math.sqrt(H))
    dense_b = jax.random.normal(k_b, (E * 2 * D,), jnp.float32) * 0.01

    logits = global_pointer_forward(last_hidden_state, attention_mask,
                                    dense_w, dense_b,
                                    ent_type_size=E, inner_dim=D)
    logits = jax.block_until_ready(logits)

    ref = _reference(last_hidden_state, attention_mask, dense_w, dense_b, E, D)
    assert logits.shape == (B, E, S, S)
    # bf16 MXU operands (f32 accumulation) vs f32 HIGHEST reference -> loosened tol
    err = float(jnp.max(jnp.abs(logits - ref) / (1.0 + jnp.abs(ref))))
    assert err < 2e-2, f"mismatch vs reference: {err}"

    print("KERNEL_OK")
</pallas_src>

<mosaic_0001>
module attributes {stable_mosaic.version = 11 : i64} {
  func.func @_global_pointer_kernel(%arg0: i32, %arg1: i32, %arg2: i32, %arg3: memref<1x16x32xbf16, #tpu.memory_space<vmem>>, %arg4: memref<1x32x128xbf16, #tpu.memory_space<vmem>>, %arg5: memref<1x1x128xf32, #tpu.memory_space<vmem>>, %arg6: memref<16x64xf32, #tpu.memory_space<vmem>>, %arg7: memref<1x16x1xf32, #tpu.memory_space<vmem>>, %arg8: memref<1x1x16xf32, #tpu.memory_space<vmem>>, %arg9: memref<1x1x16x16xf32, #tpu.memory_space<vmem>>, %arg10: memref<16x64xbf16, #tpu.memory_space<vmem>>, %arg11: memref<16x64xbf16, #tpu.memory_space<vmem>>) attributes {dimension_semantics = [#tpu.dimension_semantics<parallel>, #tpu.dimension_semantics<parallel>, #tpu.dimension_semantics<arbitrary>], iteration_bounds = array<i64: 2, 4, 1>, scalar_prefetch = 0 : i64, scratch_operands = 2 : i64, tpu.core_type = #tpu.core_type<tc>, window_params = [{transform_indices = @transform_0, window_bounds = array<i64: 1, 16, 32>}, {transform_indices = @transform_1, window_bounds = array<i64: 1, 32, 128>}, {transform_indices = @transform_2, window_bounds = array<i64: 1, 1, 128>}, {pipeline_mode = #tpu.pipeline_mode<synchronous>, transform_indices = @transform_3, window_bounds = array<i64: 16, 64>}, {transform_indices = @transform_4, window_bounds = array<i64: 1, 16, 1>}, {transform_indices = @transform_5, window_bounds = array<i64: 1, 1, 16>}, {transform_indices = @transform_6, window_bounds = array<i64: 1, 1, 16, 16>}]} {
    %c0_i32 = arith.constant 0 : i32
    %0 = arith.cmpi eq, %arg2, %c0_i32 : i32
    %1 = arith.extui %0 : i1 to i32
    %c0_i32_0 = arith.constant 0 : i32
    %2 = arith.cmpi ne, %1, %c0_i32_0 : i32
    scf.if %2 {
      %c0_12 = arith.constant 0 : index
      %c0_13 = arith.constant 0 : index
      %c0_14 = arith.constant 0 : index
      %25 = vector.load %arg3[%c0_12, %c0_13, %c0_14] : memref<1x16x32xbf16, #tpu.memory_space<vmem>>, vector<1x16x32xbf16>
      %26 = vector.shape_cast %25 : vector<1x16x32xbf16> to vector<16x32xbf16>
      %c0_15 = arith.constant 0 : index
      %c0_16 = arith.constant 0 : index
      %c0_17 = arith.constant 0 : index
      %27 = vector.load %arg4[%c0_15, %c0_16, %c0_17] : memref<1x32x128xbf16, #tpu.memory_space<vmem>>, vector<1x32x128xbf16>
      %28 = vector.shape_cast %27 : vector<1x32x128xbf16> to vector<32x128xbf16>
      %cst_18 = arith.constant dense<0.000000e+00> : vector<16x128xf32>
      %29 = tpu.matmul %26, %28, %cst_18 {dimension_numbers = #tpu.dot_dimension_numbers<[1], [0], [0], [1], [0, 0, 1, 1], [], []>} : vector<16x32xbf16>, vector<32x128xbf16>, vector<16x128xf32> -> vector<16x128xf32>
      %c0_19 = arith.constant 0 : index
      %c0_20 = arith.constant 0 : index
      %c0_21 = arith.constant 0 : index
      %30 = vector.load %arg5[%c0_19, %c0_20, %c0_21] : memref<1x1x128xf32, #tpu.memory_space<vmem>>, vector<1x1x128xf32>
      %31 = vector.shape_cast %30 : vector<1x1x128xf32> to vector<1x128xf32>
      %32 = vector.broadcast %31 : vector<1x128xf32> to vector<16x128xf32>
      %33 = arith.addf %29, %32 : vector<16x128xf32>
      %c0_22 = arith.constant 0 : index
      %c0_23 = arith.constant 0 : index
      %34 = vector.load %arg6[%c0_22, %c0_23] : memref<16x64xf32, #tpu.memory_space<vmem>>, vector<16x64xf32>
      %35 = vector.extract_strided_slice %34 {offsets = [0, 0], sizes = [16, 32], strides = [1, 1]} : vector<16x64xf32> to vector<16x32xf32>
      %36 = vector.extract_strided_slice %34 {offsets = [0, 32], sizes = [16, 32], strides = [1, 1]} : vector<16x64xf32> to vector<16x32xf32>
      %c0_24 = arith.constant 0 : index
      %c0_25 = arith.constant 0 : index
      %c0_26 = arith.constant 0 : index
      %37 = vector.load %arg7[%c0_24, %c0_25, %c0_26] : memref<1x16x1xf32, #tpu.memory_space<vmem>>, vector<1x16x1xf32>
      %38 = vector.shape_cast %37 : vector<1x16x1xf32> to vector<16x1xf32>
      %39 = vector.extract_strided_slice %33 {offsets = [0, 0], sizes = [16, 32], strides = [1, 1]} : vector<16x128xf32> to vector<16x32xf32>
      %40 = vector.extract_strided_slice %33 {offsets = [0, 32], sizes = [16, 32], strides = [1, 1]} : vector<16x128xf32> to vector<16x32xf32>
      %41 = vector.extract_strided_slice %33 {offsets = [0, 64], sizes = [16, 32], strides = [1, 1]} : vector<16x128xf32> to vector<16x32xf32>
      %42 = vector.extract_strided_slice %33 {offsets = [0, 96], sizes = [16, 32], strides = [1, 1]} : vector<16x128xf32> to vector<16x32xf32>
      %43 = arith.mulf %39, %35 : vector<16x32xf32>
      %44 = arith.mulf %40, %36 : vector<16x32xf32>
      %45 = arith.subf %43, %44 : vector<16x32xf32>
      %cst_27 = arith.constant 1.250000e-01 : f32
      %46 = vector.broadcast %cst_27 : f32 to vector<16x32xf32>
      %47 = arith.mulf %45, %46 : vector<16x32xf32>
      %48 = arith.truncf %47 : vector<16x32xf32> to vector<16x32xbf16>
      %c0_28 = arith.constant 0 : index
      %c0_29 = arith.constant 0 : index
      %49 = vector.load %arg10[%c0_28, %c0_29] : memref<16x64xbf16, #tpu.memory_space<vmem>>, vector<16x32xbf16>
      tpu.vector_store %arg10[%c0_28, %c0_29], %48 {strides = array<i32>} : memref<16x64xbf16, #tpu.memory_space<vmem>>, vector<16x32xbf16>,
      %50 = arith.mulf %40, %35 : vector<16x32xf32>
      %51 = arith.mulf %39, %36 : vector<16x32xf32>
      %52 = arith.addf %50, %51 : vector<16x32xf32>
      %cst_30 = arith.constant 1.250000e-01 : f32
      %53 = vector.broadcast %cst_30 : f32 to vector<16x32xf32>
      %54 = arith.mulf %52, %53 : vector<16x32xf32>
      %55 = arith.truncf %54 : vector<16x32xf32> to vector<16x32xbf16>
      %c0_31 = arith.constant 0 : index
      %c32 = arith.constant 32 : index
      %56 = vector.load %arg10[%c0_31, %c32] : memref<16x64xbf16, #tpu.memory_space<vmem>>, vector<16x32xbf16>
      tpu.vector_store %arg10[%c0_31, %c32], %55 {strides = array<i32>} : memref<16x64xbf16, #tpu.memory_space<vmem>>, vector<16x32xbf16>,
      %57 = arith.mulf %41, %35 : vector<16x32xf32>
      %58 = arith.mulf %42, %36 : vector<16x32xf32>
      %59 = arith.subf %57, %58 : vector<16x32xf32>
      %60 = vector.broadcast %38 : vector<16x1xf32> to vector<16x32xf32>
      %61 = arith.mulf %59, %60 : vector<16x32xf32>
      %62 = arith.truncf %61 : vector<16x32xf32> to vector<16x32xbf16>
      %c0_32 = arith.constant 0 : index
      %c0_33 = arith.constant 0 : index
      %63 = vector.load %arg11[%c0_32, %c0_33] : memref<16x64xbf16, #tpu.memory_space<vmem>>, vector<16x32xbf16>
      tpu.vector_store %arg11[%c0_32, %c0_33], %62 {strides = array<i32>} : memref<16x64xbf16, #tpu.memory_space<vmem>>, vector<16x32xbf16>,
      %64 = arith.mulf %42, %35 : vector<16x32xf32>
      %65 = arith.mulf %41, %36 : vector<16x32xf32>
      %66 = arith.addf %64, %65 : vector<16x32xf32>
      %67 = vector.broadcast %38 : vector<16x1xf32> to vector<16x32xf32>
      %68 = arith.mulf %66, %67 : vector<16x32xf32>
      %69 = arith.truncf %68 : vector<16x32xf32> to vector<16x32xbf16>
      %c0_34 = arith.constant 0 : index
      %c32_35 = arith.constant 32 : index
      %70 = vector.load %arg11[%c0_34, %c32_35] : memref<16x64xbf16, #tpu.memory_space<vmem>>, vector<16x32xbf16>
      tpu.vector_store %arg11[%c0_34, %c32_35], %69 {strides = array<i32>} : memref<16x64xbf16, #tpu.memory_space<vmem>>, vector<16x32xbf16>,
    } else {
    }
    %c16_i32 = arith.constant 16 : i32
    %3 = arith.muli %arg2, %c16_i32 : i32
    %4 = tpu.assume_multiple %3, 16 : i32
    %5 = arith.index_cast %4 : i32 to index
    %c0 = arith.constant 0 : index
    %6 = vector.load %arg10[%5, %c0] : memref<16x64xbf16, #tpu.memory_space<vmem>>, vector<16x64xbf16>
    %c0_1 = arith.constant 0 : index
    %c0_2 = arith.constant 0 : index
    %7 = vector.load %arg11[%c0_1, %c0_2] : memref<16x64xbf16, #tpu.memory_space<vmem>>, vector<16x64xbf16>
    %cst = arith.constant dense<0.000000e+00> : vector<16x16xf32>
    %8 = tpu.matmul %6, %7, %cst {dimension_numbers = #tpu.dot_dimension_numbers<[1], [1], [0], [0], [0, 0, 1, 0], [], []>} : vector<16x64xbf16>, vector<16x64xbf16>, vector<16x16xf32> -> vector<16x16xf32>
    %9 = tpu.iota {dimensions = array<i32: 0>} : vector<16x16xi32>
    %10 = vector.broadcast %4 : i32 to vector<16x16xi32>
    %11 = arith.addi %9, %10 : vector<16x16xi32>
    %12 = tpu.iota {dimensions = array<i32: 1>} : vector<16x16xi32>
    %13 = arith.cmpi sgt, %11, %12 : vector<16x16xi32>
    %cst_3 = arith.constant -1.250000e+11 : f32
    %cst_4 = arith.constant 0.000000e+00 : f32
    %14 = vector.broadcast %cst_3 : f32 to vector<16x16xf32>
    %15 = vector.broadcast %cst_4 : f32 to vector<16x16xf32>
    %16 = arith.select %13, %14, %15 : vector<16x16xi1>, vector<16x16xf32>
    %17 = arith.addf %8, %16 : vector<16x16xf32>
    %c0_5 = arith.constant 0 : index
    %c0_6 = arith.constant 0 : index
    %c0_7 = arith.constant 0 : index
    %18 = vector.load %arg8[%c0_5, %c0_6, %c0_7] : memref<1x1x16xf32, #tpu.memory_space<vmem>>, vector<1x1x16xf32>
    %19 = vector.shape_cast %18 : vector<1x1x16xf32> to vector<1x16xf32>
    %20 = vector.broadcast %19 : vector<1x16xf32> to vector<16x16xf32>
    %21 = arith.addf %17, %20 : vector<16x16xf32>
    %c0_8 = arith.constant 0 : index
    %c0_9 = arith.constant 0 : index
    %c0_10 = arith.constant 0 : index
    %c0_11 = arith.constant 0 : index
    %22 = vector.load %arg9[%c0_8, %c0_9, %c0_10, %c0_11] : memref<1x1x16x16xf32, #tpu.memory_space<vmem>>, vector<1x1x16x16xf32>
    %23 = vector.shape_cast %22 : vector<1x1x16x16xf32> to vector<16x16xf32>
    %24 = vector.shape_cast %21 : vector<16x16xf32> to vector<1x1x16x16xf32>
    tpu.vector_store %arg9[%c0_8, %c0_9, %c0_10, %c0_11], %24 {strides = array<i32>} : memref<1x1x16x16xf32, #tpu.memory_space<vmem>>, vector<1x1x16x16xf32>,
    return
  }
  func.func @transform_0(%arg0: i32, %arg1: i32, %arg2: i32) -> (i32, i32, i32) {
    %c0_i32 = arith.constant 0 : i32
    %c0_i32_0 = arith.constant 0 : i32
    %c0_i32_1 = arith.constant 0 : i32
    return %arg0, %c0_i32, %c0_i32_0 : i32, i32, i32
  }
  func.func @transform_1(%arg0: i32, %arg1: i32, %arg2: i32) -> (i32, i32, i32) {
    %c0_i32 = arith.constant 0 : i32
    %c0_i32_0 = arith.constant 0 : i32
    %c0_i32_1 = arith.constant 0 : i32
    return %arg1, %c0_i32, %c0_i32_0 : i32, i32, i32
  }
  func.func @transform_2(%arg0: i32, %arg1: i32, %arg2: i32) -> (i32, i32, i32) {
    %c0_i32 = arith.constant 0 : i32
    %c0_i32_0 = arith.constant 0 : i32
    %c0_i32_1 = arith.constant 0 : i32
    return %arg1, %c0_i32, %c0_i32_0 : i32, i32, i32
  }
  func.func @transform_3(%arg0: i32, %arg1: i32, %arg2: i32) -> (i32, i32) {
    %c0_i32 = arith.constant 0 : i32
    %c0_i32_0 = arith.constant 0 : i32
    %c0_i32_1 = arith.constant 0 : i32
    return %c0_i32, %c0_i32_0 : i32, i32
  }
  func.func @transform_4(%arg0: i32, %arg1: i32, %arg2: i32) -> (i32, i32, i32) {
    %c0_i32 = arith.constant 0 : i32
    %c0_i32_0 = arith.constant 0 : i32
    %c0_i32_1 = arith.constant 0 : i32
    return %arg0, %c0_i32, %c0_i32_0 : i32, i32, i32
  }
  func.func @transform_5(%arg0: i32, %arg1: i32, %arg2: i32) -> (i32, i32, i32) {
    %c0_i32 = arith.constant 0 : i32
    %c0_i32_0 = arith.constant 0 : i32
    %c0_i32_1 = arith.constant 0 : i32
    return %arg0, %c0_i32, %c0_i32_0 : i32, i32, i32
  }
  func.func @transform_6(%arg0: i32, %arg1: i32, %arg2: i32) -> (i32, i32, i32, i32) {
    %c0_i32 = arith.constant 0 : i32
    %c0_i32_0 = arith.constant 0 : i32
    return %arg0, %arg1, %arg2, %c0_i32 : i32, i32, i32, i32
  }
}

</mosaic_0001>

<bundles_post_ra>
// kernel: tpu_custom_call.1
= control target key start
LH: loop header
LB: loop body
LE: loop exit
PB: predicated region body
PF: predicated region fallthrough
CT: control target
= control target key end

     0   :  { %11 = vsyncpa [#allocation5], 0  ;;  %s1418_s0 = inlined_call_operand.vmem [shape: bf16[2,16,32], index: 0, kind: input, shape index: {}]   ;;  %s1419_s1 = inlined_call_operand.hbm [shape: bf16[4,32,128], index: 1, kind: input, shape index: {}]   ;;  %s1420_s2 = inlined_call_operand.vmem [shape: f32[4,1,128], index: 2, kind: input, shape index: {}]   ;;  %s1421_s3 = inlined_call_operand.vmem [shape: f32[16,64], index: 3, kind: input, shape index: {}]   ;;  %s1422_s4 = inlined_call_operand.vmem [shape: f32[2,16,1], index: 4, kind: input, shape index: {}]   ;;  %s1423_s5 = inlined_call_operand.vmem [shape: f32[2,1,16], index: 5, kind: input, shape index: {}]   ;;  %s1424_s6 = inlined_call_operand.hbm [shape: f32[2,4,16,16], index: 6, kind: output, shape index: {}]  }
   0x1   :  { %13 = vsyncpa [#allocation5 + $0x1], 0 }
   0x2   :  { %14 = vsyncpa [#allocation6], 0 }
   0x3   :  { %16 = vsyncpa [#allocation6 + $0x1], 0  ;;  %s1149_s21 = smov 0   ;;  %s1151_s22 = smov 0  }
   0x4   :  { %s1153_s23 = smov 0   ;;  %s1155_s24 = smov 0  }
   0x5   :  { %s1157_s25 = smov 0   ;;  %s1159_s26 = smov 0  }
   0x6   :  { %s1161_s27 = smov 0   ;;  %s1163_s28 = smov 0  }
   0x7   :  { %s1165_s29 = smov 0   ;;  %s1167_s30 = smov 0  }
   0x8   :  { %s1169_s7 = smov 0  }
   0x9 LB: > { %1430 = sst [smem:[#allocation10_spill]] %s1092_s29  ;;  %s782_s8 = sadd.s32 4294967295, %s1100_s7   ;;  %s1100_s7 = sphi %s1169_s7, %s22_s7   ;;  %s1096_s30 = sphi %s1167_s30, %s1445_s30   ;;  %s1092_s29 = sphi %s1165_s29, %s1444_s29   ;;  %s1088_s28 = sphi %s1163_s28, %s1443_s28   ;;  %s1084_s27 = sphi %s1161_s27, %s1442_s27   ;;  %s1080_s26 = sphi %s1159_s26, %s1451_s26   ;;  %s1076_s25 = sphi %s1157_s25, %s1450_s25   ;;  %s1072_s24 = sphi %s1155_s24, %s1449_s24   ;;  %s1068_s23 = sphi %s1153_s23, %s1448_s23   ;;  %s1064_s22 = sphi %s1151_s22, %s1447_s22   ;;  %s1060_s21 = sphi %s1149_s21, %s1446_s21  }
   0xa   : > { %1431 = sst [smem:[#allocation11_spill]] %s1096_s30  ;;  %s783_s9 = sadd.s32 4294967294, %s1100_s7  }
   0xb   : > { %s37_s10 = sadd.s32 1, %s1092_s29  ;;  %s41_s11 = sadd.s32 1, %s1096_s30 }
   0xc   : > { %p39_p0 = scmp.ge.s32.totalorder %s37_s10, 4  ;;  %s74_s12 = sadd.s32 1, %s1080_s26 }
   0xd   : > { %p81_p1 = scmp.ne.s32.totalorder %s1080_s26, %s1076_s25  ;;  %p82_p2 = scmp.eq.s32.totalorder %s1100_s7, 0 }
   0xe   : > { %s1453_s10 = smov (%p39_p0, %s37_s10), 0  ;;  %s1455_s11 = smov (!%p39_p0, %s41_s11), %s1096_s30 }
   0xf   : > { %1432 = sst [smem:[#allocation12_spill]] %s1453_s10  ;;  %s71_s13 = ssub.s32 %s1092_s29, %s1453_s10 }
  0x10   : > { %p1215_p3 = por %p82_p2, %p81_p1  ;;  %p43_p4 = scmp.ge.s32.totalorder %s1455_s11, 2 }
  0x11   : > { %p72_p5 = scmp.eq.s32.totalorder %s71_s13, 0  ;;  %p87_p6 = scmp.ne.s32.totalorder %s1076_s25, %s1072_s24 }
  0x12   : > { %p88_p7 = scmp.eq.s32.totalorder %s782_s8, 0  ;;  %s1457_s11 = smov (%p43_p4, %s1455_s11), 0 }
  0x13   : > { %1434 = sst [smem:[#allocation13_spill]] %s1457_s11  ;;  %s196_s17 = ssub.s32 %s1096_s30, %s1457_s11 }
  0x14   : > { %s1223_s15 = scalar_select %p72_p5, %s1080_s26, %s74_s12  }
  0x15   : > { %p1225_p8 = por %p88_p7, %p87_p6  ;;  %s198_s18 = sor.u32 %s196_s17, %s71_s13 }
  0x16   : > { %s203_s19 = sadd.s32 1, %s1068_s23  ;;  %p201_p9 = scmp.eq.s32.totalorder %s198_s18, 0 }
  0x17   : > { %p213_p10 = scmp.ne.s32.totalorder %s1068_s23, %s1064_s22  ;;  %p214_p11 = scmp.eq.s32.totalorder %s782_s8, 7 }
  0x18   : > { %p219_p12 = scmp.ne.s32.totalorder %s1064_s22, %s1060_s21  ;;  %p220_p0 = scmp.eq.s32.totalorder %s783_s9, 7 }
  0x19   : > { %s1237_s20 = scalar_select %p201_p9, %s1068_s23, %s203_s19  }
  0x1a   : > { %p1239_p13 = por %p214_p11, %p213_p10  ;;  %p843_p1 = scmp.lt.s32.totalorder %s1100_s7, 8 }
  0x1b   : > { %p1244_p2 = por %p220_p0, %p219_p12  ;;  %s251_s13 = sand.u32 1, %s1080_s26  }
  0x1c   : > { %s1436_s24 = scalar_select %p1239_p13, 1, 0 }
  0x1d   : > { %s1437_s12 = scalar_select %p1244_p2, 1, 0 }
  0x1e   : > { %s786_s17 = sshll.u32 %s251_s13, 4  ;;  %s809_s18 = sshll.u32 %s1092_s29, 8 }
  0x1f   : > { %s1253_s8 = scalar_lea.hbm %s1419_s1, %s809_s18  ;;  %s255_s19 = scalar_lea.vmem [#allocation4], %s786_s17 }
  0x20   : > { %s262_s30 = sshll.u32 %s255_s19, 4  ;;  %p1259_p4 = pnand %p843_p1, %p1215_p3  ;;  %s1255_s30 = int_to_ptr.vmem [resolvable:$true] %s262_s30 }
  0x21   : > { %s1264_s29 = scalar_lea.sflag [#allocation5], %s251_s13  ;;  %s948_s10 = scalar_lea.hbm %s1253_s8, 256 }
  0x22   : > { %p949_p6 = scmp.ne.s32.totalorder %s1253_s8, %s948_s10  ;;  %p950_p7 = pneg %p1259_p4 }
  0x23   : > { %s953_s14 = scalar_lea.hbm %s1419_s1, 1024  ;;  %p954_p3 = scmp.lt.u32.totalorder %s1253_s8, %s1419_s1 }
  0x24   : > { %p951_p9 = pnand %p950_p7, %p949_p6  ;;  %p955_p11 = scmp.lt.u32.totalorder %s953_s14, %s948_s10 }
  0x25   : > { %p957_p0 = scmp.lt.u32.totalorder %s948_s10, %s1253_s8 }
  0x26   : > { %p952_p10 = pneg %p951_p9  ;;  %p956_p12 = por %p955_p11, %p954_p3 }
  0x28   : > { %p958_p1 = por %p957_p0, %p956_p12 }
  0x2a   : > { %p959_p5 = pnand %p958_p1, %p952_p10 }
  0x2c   : > { %962 = shalt.err (!%p959_p5)
}
  0x2d   : > { %s963_s13 = scalar_lea.vmem %s1255_s30, 256  ;;  %s1102_s11 = smov [#allocation4]  }
  0x2e   : > { %p964_p6 = scmp.ne.s32.totalorder %s1255_s30, %s963_s13  ;;  %s968_s17 = sshll.u32 %s1102_s11, 4  ;;  %s969_s17 = int_to_ptr.vmem [resolvable:$false] %s968_s17 }
  0x2f   : > { %s970_s18 = scalar_lea.vmem %s969_s17, 512  ;;  %p971_p13 = scmp.lt.s32.totalorder %s1255_s30, %s969_s17 }
  0x30   : > { %p966_p9 = pnand %p964_p6, %p950_p7  ;;  %p972_p3 = scmp.lt.s32.totalorder %s970_s18, %s963_s13 }
  0x32   : > { %p967_p2 = pneg %p966_p9  ;;  %p973_p11 = por %p972_p3, %p971_p13 }
  0x34   : > { %p974_p12 = pnand %p973_p11, %p967_p2 }
  0x36   : > { %977 = shalt.err (!%p974_p12)
}
  0x37   : > { %s1103_s10 = smov 64   ;;  %s1104_s14 = smov 4  }
  0x38   : > { %838 = dma.hbm_to_vmem [thread:$0]  (!%p1259_p4), %s1253_s8, 256, %s1255_s30, %s1264_s29, %s1103_s10, %s1103_s10, %s1104_s14  }
  0x39   : > { %p290_p5 = scmp.lt.s32.totalorder %s1100_s7, 9  ;;  %p1439_p7 = scmp.ge.s32.totalorder %s1100_s7, 1 }
  0x3b   : > { %p291_p10 = pnand %p1439_p7, %p290_p5 }
  0x3c   : > { %s296_s19 = sand.u32 (!%p291_p10), 1, %s1076_s25  }
  0x3d   : > { %294 = sbr.rel (%p291_p10) target bundleno = 789 (0x315), region = 44  ;;  %s790_s13 = sshll.u32 (!%p291_p10), %s296_s19, 4 }
  0x3e   : > { %s297_s11 = scalar_lea.sflag (!%p291_p10), [#allocation5], %s296_s19  ;;  %s300_s17 = scalar_lea.vmem (!%p291_p10), [#allocation4], %s790_s13 }
  0x44   : > { %1051 = dma.done.wait (%p1225_p8), %s297_s11, 256  }
  0x45   : > { %1053 = vsyncadd (%p1225_p8), %s297_s11, 4294967040  ;;  %p345_p13 = scmp.lt.s32.totalorder %s1088_s28, 1  ;;  %v1105_v0 = vmov 0.0   ;;  %vm1106_vm0 = vmmov 0   ;;  %v1107_v1 = vmov 0   ;;  %v945_v2 = vld [vmem:[%s300_s17] sm:$0xff]  }
  0x46   : > { %817 = vmatprep.subr.bf16.mxu0 %v1105_v0  ;;  %821 = vmatprep.mubr.msk.bf16.mxu0 %vm1106_vm0, %v1105_v0  ;;  %v946_v3 = vld [vmem:[%s300_s17 + $0x8] sm:$0xff]   ;;  %v442_v4 = vld [vmem:[%s1421_s3] sm:$0xff]  ;;  %s1108_s19 = smov 32   ;;  %s1109_s13 = smov 64   ;;  %vm397_vm1 = vcmask 261120   ;;  %vm493_vm2 = vcmask 523520  }
  0x47   : > { %s1304_s29 = scalar_select %p345_p13, %s1088_s28, 1  ;;  %944 = vset.pattern.permute.xlu1 %v1107_v1  ;;  %943 = vset.pattern.permute.xlu0 %v1107_v1  ;;  %v443_v6 = vld [vmem:[%s1421_s3 + $0x8] sm:$0xff]  ;;  %vm568_vm3 = vcmask 523264   ;;  %vm625_vm6 = vcmask 130048  }
  0x48   : > { %825 = vmatprep.subr.bf16.mxu1 %v1105_v0  ;;  %827 = vmatprep.mubr.msk.bf16.mxu1 %vm1106_vm0, %v1105_v0  ;;  %p350_p8 = scmp.lt.s32.totalorder %s1084_s27, 3  ;;  %s805_s17 = sshll.u32 %s1088_s28, 3 }
  0x49   : > { %s810_s30 = sshll.u32 %s1304_s29, 3  ;;  %818 = vmatpush3.bf16.msra.mxu0 %v945_v2  ;;  %s811_s14 = sshll.u32 %s1304_s29, 4  ;;  %464 = vrot.lane.b32.xlu1 %v442_v4, %s1108_s19  ;;  %v556_v2 = vlaneseq }
  0x4a   : > { %s349_s9 = scalar_lea.vmem %s1418_s0, %s810_s30  ;;  %819 = vmatprep.subr.bf16.mxu0 %v1105_v0  ;;  %495 = vrot.lane.b32.xlu0 %v442_v4, %s1109_s13  ;;  %s357_s8 = scalar_lea.vmem %s1422_s4, %s811_s14 }
  0x4b   : > { %v947_v5 = vld [vmem:[%s349_s9] sm:$0xff]   ;;  %v445_v7 = vld [vmem:[%s357_s8 + $0x8] sm:$0xff]  ;;  %s1110_s9 = smov 96   ;;  %s342_s14 = sand.u32 1, %s1064_s22  }
  0x4c   : > { %v444_v8 = vld [vmem:[%s357_s8] sm:$0xff]  ;;  %s351_s18 = scalar_select %p350_p8, %s1084_s27, 3 }
  0x4d   : > { %820 = vmatpush3.bf16.msra.mxu0 %v946_v3  ;;  %466 = vrot.lane.b32.xlu1 %v443_v6, %s1108_s19  ;;  %v557_v3 = vshrl.u32 %v556_v2, 7  ;;  %p1440_p4 = scmp.ne.s32.totalorder %s1436_s24, 0 }
  0x4e   : > { %497 = vrot.lane.b32.xlu0 %v443_v6, %s1109_s13  ;;  %s352_s16 = scalar_lea.vmem %s1420_s2, %s351_s18 }
  0x4f   : > { %v796_v10 = vld [vmem:[%s352_s16] ss:$0 sm:$0xff] }
  0x50   : > { %822 = vmatmul.mubr.msk.bf16.vlgmr.msra.gmra.mrb[0].mxu0 %vm397_vm1, %v947_v5  ;;  %v558_v5 = vadd.s32 8, %v557_v3 }
  0x51   : > { %520 = vperm.xlu1 %944, %v445_v7  }
  0x52   : > { %515 = vperm.xlu0 %943, %v444_v8  }
  0x55   : > { %472 = vrot.lane.b32.xlu1 %v442_v4, %s1110_s9 }
  0x56   : > { %474 = vrot.lane.b32.xlu0 %v443_v6, %s1110_s9 }
  0xbb   : > { %v465_v14 = vpop.permute.xlu1 %464 }
  0xbc   : > { %v496_v9 = vpop.permute.xlu0 %495 }
  0xbf   : > { %v467_v22 = vpop.permute.xlu1 %466 }
  0xc0   : > { %v498_v19 = vpop.permute.xlu0 %497 }
  0xd0   : > { %v521_v26 = vpop.permute.xlu1 %520 }
  0xd1   : > { %v516_v27 = vpop.permute.xlu0 %515 }
  0xd4   : > { %v473_v28 = vpop.permute.xlu1 %472 }
  0xd5   : > { %v475_v29 = vpop.permute.xlu0 %474 }
 0x123   : > { %v435_v11 = vpop.f32.mrb[0].mxu0 }
 0x124   : > { %v436_v12 = vadd.f32 %v796_v10, %v435_v11  ;;  %v823_v13 = vpop.f32.mrb[1].mxu0 }
 0x125   : > { %v438_v15 = vpop.f32.mrb[2].mxu0 }
 0x126   : > { %v439_v16 = vadd.f32 %v796_v10, %v438_v15  ;;  %v824_v17 = vpop.f32.mrb[3].mxu0  ;;  %v501_v18 = vmul.f32 %v496_v9, %v436_v12  ;;  %v470_v21 = vmul.f32 %v465_v14, %v436_v12  ;;  %v446_v24 = vmul.f32 %v442_v4, %v436_v12 }
 0x127   : > { %v478_v33 = vmul.f32 %v473_v28, %v436_v12  ;;  %v563_v4 = vand.u32 127, %v556_v2 }
 0x128   : > { %505 = vrot.lane.b32.xlu1 %v501_v18, %s1110_s9  ;;  %v502_v20 = vmul.f32 %v498_v19, %v439_v16  ;;  %v471_v23 = vmul.f32 %v467_v22, %v439_v16  ;;  %v447_v25 = vmul.f32 %v443_v6, %v439_v16  ;;  %v479_v36 = vmul.f32 %v475_v29, %v439_v16 }
 0x129   : > { %vm564_vm4 = vcmp.gt.s32.totalorder %v557_v3, %v563_v4  ;;  %vm565_vm5 = vcmp.gt.s32.totalorder %v558_v5, %v563_v4 }
 0x12a   : > { %507 = vrot.lane.b32.xlu0 %v502_v20, %s1110_s9  ;;  %v566_v6 = vsel %vm564_vm4, -1.25e+11, %v1105_v0  ;;  %v567_v9 = vsel %vm565_vm5, -1.25e+11, %v1105_v0 }
 0x12c   : > { %533 = vrot.lane.b32.xlu1 %v470_v21, %s1108_s19 }
 0x12e   : > { %535 = vrot.lane.b32.xlu0 %v471_v23, %s1108_s19 }
 0x130   : > { %450 = vrot.lane.b32.xlu1 %v446_v24, %s1110_s9 }
 0x132   : > { %452 = vrot.lane.b32.xlu0 %v447_v25, %s1110_s9  ;;  %s360_s9 = scalar_lea.vmem %s1423_s5, %s1304_s29 }
 0x133   : > { %v802_v8 = vld [vmem:[%s360_s9] ss:$0 sm:$0xff] }
 0x19a   : > { %v506_v30 = vpop.permute.xlu1 %505 }
 0x19b   : > { %v511_v31 = vsub.f32 %v501_v18, %v506_v30 }
 0x19c   : > { %v508_v32 = vpop.permute.xlu0 %507 }
 0x19d   : > { %v512_v34 = vsub.f32 %v502_v20, %v508_v32  ;;  %v523_v37 = vmul.f32 %v516_v27, %v511_v31 }
 0x19e   : > { %v534_v35 = vpop.permute.xlu1 %533 }
 0x19f   : > { %v524_v38 = vmul.f32 %v521_v26, %v512_v34  ;;  %v539_v39 = vadd.f32 %v534_v35, %v478_v33 }
 0x1a0   : > { %v536_v40 = vpop.permute.xlu0 %535 }
 0x1a1   : > { %v540_v41 = vadd.f32 %v536_v40, %v479_v36  ;;  %v525_v42 = vpack.c.bf16 %v524_v38, %v523_v37  ;;  %v541_v44 = vmul.f32 %v539_v39, %v516_v27 }
 0x1a2   : > { %v451_v43 = vpop.permute.xlu1 %450 }
 0x1a3   : > { %v542_v45 = vmul.f32 %v540_v41, %v521_v26  ;;  %v456_v46 = vsub.f32 %v446_v24, %v451_v43  ;;  %527 = vrot.lane.b32.xlu1 %v525_v42, %s1109_s13 }
 0x1a4   : > { %v453_v47 = vpop.permute.xlu0 %452 }
 0x1a5   : > { %v457_v48 = vsub.f32 %v447_v25, %v453_v47  ;;  %v543_v49 = vpack.c.bf16 %v542_v45, %v541_v44  ;;  %v458_v50 = vmul.f32 0.125, %v456_v46 }
 0x1a7   : > { %v459_v51 = vmul.f32 0.125, %v457_v48  ;;  %482 = vrot.lane.b32.xlu1 %v478_v33, %s1108_s19  ;;  %545 = vrot.lane.b32.xlu0 %v543_v49, %s1109_s13  ;;  %s804_s13 = sshll.u32 %s1084_s27, 1 }
 0x1a8   : > { %s643_s18 = sadd.s32 %s805_s17, %s804_s13  ;;  %s1111_s17 = smov [#allocation7]  }
 0x1a9   : > { %v460_v52 = vpack.c.bf16 %v459_v51, %v458_v50  ;;  %s806_s10 = sshll.u32 %s643_s18, 7  ;;  %s982_s30 = sshll.u32 %s1111_s17, 4  ;;  %s983_s30 = int_to_ptr.vmem [resolvable:$false] %s982_s30 }
 0x1aa   : > { %s1353_s29 = scalar_lea.hbm %s1424_s6, %s806_s10  ;;  %s984_s8 = scalar_lea.vmem %s983_s30, 512 }
 0x1ab   : > { %461 = vst.msk [vmem:[#allocation2] sm:$0xff] %vm397_vm1, %v460_v52  ;;  %484 = vrot.lane.b32.xlu0 %v479_v36, %s1108_s19  ;;  %s791_s19 = sshll.u32 %s342_s14, 4 }
 0x1ac   : > { %s344_s11 = scalar_lea.vmem [#allocation7], %s791_s19  ;;  %s1357_s19 = scalar_lea.sflag [#allocation6], %s342_s14 }
 0x1ad   : > { %s646_s16 = sshll.u32 %s344_s11, 4  ;;  %s1355_s16 = int_to_ptr.vmem [resolvable:$true] %s646_s16 }
 0x1ae   : > { %s978_s13 = scalar_lea.vmem %s1355_s16, 256  ;;  %p985_p6 = scmp.lt.s32.totalorder %s1355_s16, %s983_s30 }
 0x1af   : > { %p979_p2 = scmp.ne.s32.totalorder %s1355_s16, %s978_s13  ;;  %p986_p9 = scmp.lt.s32.totalorder %s984_s8, %s978_s13 }
 0x1b1   : > { %p980_p0 = pnand %p979_p2, %p1440_p4  ;;  %p987_p3 = por %p986_p9, %p985_p6 }
 0x1b3   : > { %p981_p1 = pneg %p980_p0 }
 0x1b5   : > { %p988_p11 = pnand %p987_p3, %p981_p1 }
 0x215   : > { %v528_v53 = vpop.permute.xlu1 %527 }
 0x216   : > { %530 = vst.msk [vmem:[#allocation3] sm:$0xff] %vm397_vm1, %v528_v53 }
 0x219   : > { %v483_v54 = vpop.permute.xlu1 %482  ;;  %v546_v55 = vpop.permute.xlu0 %545 }
 0x21a   : > { %548 = vst.msk [vmem:[#allocation3] sm:$0xff] %vm493_vm2, %v546_v55  ;;  %v488_v56 = vadd.f32 %v483_v54, %v470_v21 }
 0x21c   : > { %v490_v59 = vmul.f32 0.125, %v488_v56 }
 0x21d   : > { %v485_v57 = vpop.permute.xlu0 %484 }
 0x21e   : > { %v489_v58 = vadd.f32 %v485_v57, %v471_v23 }
 0x220   : > { %v491_v60 = vmul.f32 0.125, %v489_v58 }
 0x221   : > { %v555_v61 = vld [vmem:[#allocation3] sm:$0xff] }
 0x222   : > { %v492_v62 = vpack.c.bf16 %v491_v60, %v490_v59  ;;  %v573_v63 = vsel %vm568_vm3, %v555_v61, 0 }
 0x223   : > { %826 = vmatpush3.bf16.xpose.msra.mxu1 %v573_v63 }
 0x224   : > { %494 = vst.msk [vmem:[#allocation2] sm:$0xff] %vm493_vm2, %v492_v62 }
 0x22b   : > { %v554_v1 = vld [vmem:[#allocation2] sm:$0xff] }
 0x22c   : > { %828 = vmatmul.mubr.msk.bf16.vlgmr.msra.gmra.mrb[0].mxu1 %vm568_vm3, %v554_v1 }
 0x2ff   : > { %v609_v7 = vpop.f32.mrb[0].mxu1 }
 0x300   : > { %v610_v10 = vadd.f32 %v609_v7, %v566_v6  ;;  %v829_v11 = vpop.f32.mrb[1].mxu1 }
 0x301   : > { %v612_v12 = vpop.f32.mrb[2].mxu1 }
 0x302   : > { %v623_v13 = vadd.f32 %v802_v8, %v610_v10  ;;  %v613_v14 = vadd.f32 %v612_v12, %v567_v9  ;;  %v830_v15 = vpop.f32.mrb[3].mxu1 }
 0x304   : > { %626 = vst.msk [vmem:[%s344_s11] sm:$0xff] %vm625_vm6, %v623_v13  ;;  %v624_v0 = vadd.f32 %v802_v8, %v613_v14 }
 0x306   : > { %627 = vst.msk [vmem:[%s344_s11 + $0x8] sm:$0xff] %vm625_vm6, %v624_v0 }
 0x307   : > { %991 = shalt.err (!%p988_p11)
}
 0x308   : > { %s992_s14 = scalar_lea.hbm %s1353_s29, 256  ;;  %s996_s10 = scalar_lea.hbm %s1424_s6, 2048 }
 0x309   : > { %p993_p12 = scmp.ne.s32.totalorder %s1353_s29, %s992_s14  ;;  %p997_p10 = scmp.lt.u32.totalorder %s1353_s29, %s1424_s6 }
 0x30a   : > { %p998_p13 = scmp.lt.u32.totalorder %s996_s10, %s992_s14  ;;  %p1000_p2 = scmp.lt.u32.totalorder %s992_s14, %s1353_s29 }
 0x30b   : > { %p994_p5 = pnand %p993_p12, %p1440_p4 }
 0x30c   : > { %p999_p8 = por %p998_p13, %p997_p10 }
 0x30d   : > { %p995_p7 = pneg %p994_p5 }
 0x30e   : > { %p1001_p0 = por %p1000_p2, %p999_p8 }
 0x310   : > { %p1002_p1 = pnand %p1001_p0, %p995_p7 }
 0x312   : > { %1005 = shalt.err (!%p1002_p1)
}
 0x313   : > { %s1112_s28 = smov 128   ;;  %s1113_s13 = smov 8  }
 0x314   : > { %833 = dma.vmem_to_hbm [thread:$0]  (%p1440_p4), %s1355_s16, 256, %s1353_s29, %s1357_s19, %s1112_s28, %s1112_s28, %s1113_s13  }
 0x315 PF: > { %p844_p6 = scmp.ge.s32.totalorder %s1100_s7, 2  ;;  %s661_s17 = sand.u32 1, %s1060_s21  }
 0x316   : > { %p1441_p9 = scmp.ne.s32.totalorder %s1437_s12, 0  ;;  %s662_s30 = scalar_lea.sflag [#allocation6], %s661_s17 }
 0x318   : > { %p840_p3 = pnand %p844_p6, %p1441_p9 }
 0x31a   : > { %1055 = dma.done.wait (!%p840_p3), %s662_s30, 256  }
 0x31b   : > { %1057 = vsyncadd (!%p840_p3), %s662_s30, 4294967040  ;;  %s22_s7 = sadd.s32 1, %s1100_s7   ;;  %s1442_s27 = sld [smem:[#allocation10_spill]] }
 0x31c   : > { %p19_p11 = scmp.ge.s32.totalorder %s22_s7, 10   ;;  %s1443_s28 = sld [smem:[#allocation11_spill]] }
 0x31d   : > { %s1444_s29 = sld [smem:[#allocation12_spill]]  ;;  %s1445_s30 = sld [smem:[#allocation13_spill]] }
 0x31e   : > { %s1446_s21 = smov %s1064_s22  ;;  %s1447_s22 = smov %s1068_s23 }
 0x31f   : > { %s1448_s23 = smov %s1237_s20  ;;  %s1449_s24 = smov %s1076_s25 }
 0x320   : > { %s1450_s25 = smov %s1080_s26  ;;  %s1451_s26 = smov %s1223_s15 }
 0x321   :  { %21 = sbr.rel (!%p19_p11) target bundleno = 9 (0x9), region = 106 }
 0x328   :  { %667 = vsyncpa [#allocation5], 1 }
 0x329   :  { %669 = vsyncpa [#allocation5 + $0x1], 1 }
 0x32a   :  { %670 = vsyncpa [#allocation6], 1 }
 0x32b   :  { %672 = vsyncpa [#allocation6 + $0x1], 1 }

</bundles_post_ra>
